<compile_context>
chip_gen: v6e
topology: v6e:2x2x1
jax: 0.10.0
libtpu: 0.0.40
codegen_flags: <defaults>
</compile_context>

<pallas_src>
import jax
import jax.numpy as jnp
from jax.experimental import pallas as pl
from jax.experimental.pallas import tpu as pltpu


_LANES = 128
_PARAM_ORDER = ("oW", "ob", "W1", "b1", "W2", "b2", "W3", "b3",
                "W1c", "b1c", "W2c", "b2c", "W3c", "b3c")


def _round_up(x, m):
    return (x + m - 1) // m * m


def _pack_slab(named_arrays):
    """Pack [(name, 2-D array), ...] into one (rows, 128) f32 slab.

    Every part is zero-padded to 128 lanes and its row count rounded up to a
    multiple of 8, so each in-kernel slice starts at an aligned sublane offset.
    Returns (slab, {name: (row_offset, rows, cols)}).
    """
    offsets, blocks, row = {}, [], 0
    for name, a in named_arrays:
        a = jnp.asarray(a, jnp.float32)
        r, c = a.shape
        assert c <= _LANES, f"{name}: {c} columns exceed {_LANES} lanes"
        rp = _round_up(max(r, 1), 8)
        blk = jnp.zeros((rp, _LANES), jnp.float32).at[:r, :c].set(a)
        offsets[name] = (row, r, c)
        blocks.append(blk)
        row += rp
    return jnp.concatenate(blocks, axis=0), offsets


# ------------------------------ fused kernel ----------------------------------

def _make_kernel(B, N, N_ori, in_dim, L, C, a_off, w_off):
    f32 = jnp.float32

    def sl(ref, offsets, name):
        off, r, c = offsets[name]
        return ref[off:off + r, :c]          # static, sublane-aligned start

    def elu(x):                               # nn.ELU(alpha=1)
        return jnp.where(x > 0, x, jnp.exp(x) - 1.0)

    def mm(a, b):
        return jnp.dot(a, b, preferred_element_type=f32)

    def kernel(act_ref, wp_ref, out_ref):
        A = lambda n: sl(act_ref, a_off, n)
        W = lambda n: sl(wp_ref, w_off, n)

        G    = A("G")      # (B*N,  B*N)    block-diag padded adjacency
        G1   = A("G1")     # (B*N,  B*No)   block-diag of g[:, :, 1:1+N_ori]
        OG   = A("OG")     # (B*No, B*No)   block-diag original adjacency
        G0   = A("G0")     # (B,    B*N)    node-0 row of each padded graph
        Gsel = A("Gsel")   # (B*No, N)      rows 1..N_ori of each padded graph
        OH   = A("OH")     # (B*No, in_dim)
        lab  = A("LAB")    # (B, 1)         labels as f32 (exact small ints)

        # ---- norm_g folded into the right operand of every g@h ----
        # gn[i,j] = g[i,j] / deg[j]  (deg[j] = sum_k g[j,k])  =>  gn@h == g@(inv_deg*h)
        inv_d  = pl.reciprocal(jnp.sum(G,    axis=1, keepdims=True), approx=False)
        inv_do = pl.reciprocal(jnp.sum(OG,   axis=1, keepdims=True), approx=False)
        inv_d1 = pl.reciprocal(jnp.sum(Gsel, axis=1, keepdims=True), approx=False)

        # ---- ori_gcn1, reassociated: elu(og @ (inv_do * (oh @ oW)) + ob) ----
        ohW = mm(OH, W("oW"))
        oh1 = elu(mm(OG, inv_do * ohW) + W("ob"))                 # (B*No, L)

        # ---- gcn1: zero-pad/scatter replaced by pre-sliced columns G1 ----
        h1 = elu(mm(mm(G1, inv_d1 * oh1), W("W1")) + W("b1"))     # (B*N, L)

        # ---- gcn2 (L -> 2L) ----
        h2 = elu(mm(mm(G, inv_d * h1), W("W2")) + W("b2"))        # (B*N, 2L)

        # ---- gcn3 (2L -> 2L): only node-0 rows are needed downstream ----
        emb = elu(mm(mm(G0, inv_d * h2), W("W3")) + W("b3"))      # (B, 2L)

        # ---- classifier (out_l_1/2/3, dropout = identity) ----
        h = elu(mm(emb, W("W1c")) + W("b1c"))
        h = elu(mm(h,   W("W2c")) + W("b2c"))
        logits = mm(h,  W("W3c")) + W("b3c")                      # (B, C)

        # ---- log_softmax + nll_loss(mean) + argmax accuracy ----
        m = jnp.max(logits, axis=1, keepdims=True)
        lse = m + jnp.log(jnp.sum(jnp.exp(logits - m), axis=1, keepdims=True))
        logp = logits - lse

        col = jax.lax.broadcasted_iota(jnp.int32, (B, C), 1)
        onehot = col == lab.astype(jnp.int32)
        loss = -jnp.sum(jnp.where(onehot, logp, 0.0)) / B

        maxv = jnp.max(logp, axis=1, keepdims=True)
        colf = col.astype(f32)
        preds = jnp.min(jnp.where(logp == maxv, colf, float(C)),
                        axis=1, keepdims=True)                    # first maximal index
        acc = jnp.mean((preds == lab).astype(f32))

        # lane-dense single output block: [0,0] = loss, [0,1] = acc, rest 0
        lane = jax.lax.broadcasted_iota(jnp.int32, (1, _LANES), 1)
        out_ref[...] = jnp.where(lane == 0, loss, jnp.where(lane == 1, acc, 0.0))

    return kernel


# -------------------------------- wrapper --------------------------------------

def gnet_forward(gs, ori_gs, ori_hs, labels, params):
    gs = jnp.asarray(gs, jnp.float32)
    ori_gs = jnp.asarray(ori_gs, jnp.float32)
    ori_hs = jnp.asarray(ori_hs, jnp.float32)

    B, N, _ = gs.shape
    _, N_ori, in_dim = ori_hs.shape
    L = params["W1"].shape[0]
    C = params["W3c"].shape[1]
    assert N >= N_ori + 1, "padded graph must have at least N_ori + 1 nodes"
    assert B * N <= _LANES, "block-diagonalized batch must fit in 128 lanes"

    # ---- XLA-side layout plumbing (no model math): block-diagonalize batch ----
    eye = jnp.eye(B, dtype=jnp.float32)
    G_bd  = jnp.einsum('ab,arc->arbc', eye, gs).reshape(B * N, B * N)
    G1_bd = jnp.einsum('ab,arc->arbc', eye,
                       gs[:, :, 1:1 + N_ori]).reshape(B * N, B * N_ori)
    OG_bd = jnp.einsum('ab,arc->arbc', eye, ori_gs).reshape(B * N_ori, B * N_ori)
    G0    = jnp.einsum('ab,aj->abj', eye, gs[:, 0, :]).reshape(B, B * N)
    Gsel  = gs[:, 1:1 + N_ori, :].reshape(B * N_ori, N)   # rows 1..N_ori (degrees)
    OH    = ori_hs.reshape(B * N_ori, in_dim)
    lab_f = labels.reshape(B, 1).astype(jnp.float32)

    act_slab, a_off = _pack_slab([
        ("G", G_bd), ("G1", G1_bd), ("OG", OG_bd), ("G0", G0),
        ("Gsel", Gsel), ("OH", OH), ("LAB", lab_f)])
    w_slab, w_off = _pack_slab([(n, params[n]) for n in _PARAM_ORDER])

    kernel = _make_kernel(B, N, N_ori, in_dim, L, C, a_off, w_off)

    # Single invocation, whole batch resident in VMEM (<0.3 MiB total):
    # exactly 2 input DMAs (activation slab + weight slab) + 1 output DMA.
    out = pl.pallas_call(
        kernel,
        out_shape=jax.ShapeDtypeStruct((1, _LANES), jnp.float32),
        grid=(1,),
        in_specs=[
            pl.BlockSpec(act_slab.shape, lambda i: (0, 0)),
            pl.BlockSpec(w_slab.shape, lambda i: (0, 0)),
        ],
        out_specs=pl.BlockSpec((1, _LANES), lambda i: (0, 0)),
        compiler_params=pltpu.CompilerParams(
            dimension_semantics=("arbitrary",)),
    )(act_slab, w_slab)

    return out[0, 0], out[0, 1]


# ------------------------------ pure-JAX reference ------------------------------

def ref_forward(gs, ori_gs, ori_hs, labels, p):
    def elu(x):
        return jnp.where(x > 0, x, jnp.exp(x) - 1.0)

    def norm(g):
        return g / jnp.sum(g, axis=1)  # torch-style broadcast over last dim

    def gcn(g, h, W, b):
        return elu(g @ h @ W + b)

    outs = []
    for i in range(gs.shape[0]):
        g, og = norm(gs[i]), norm(ori_gs[i])
        oh = gcn(og, ori_hs[i], p["oW"], p["ob"])
        h = jnp.zeros((g.shape[0], oh.shape[1]), jnp.float32)
        h = h.at[1:oh.shape[0] + 1].set(oh)
        h = gcn(g, h, p["W1"], p["b1"])
        h = gcn(g, h, p["W2"], p["b2"])
        h = gcn(g, h, p["W3"], p["b3"])
        outs.append(h[0])
    hs = jnp.stack(outs, 0)
    h = elu(hs @ p["W1c"] + p["b1c"])
    h = elu(h @ p["W2c"] + p["b2c"])
    logits = h @ p["W3c"] + p["b3c"]
    logp = jax.nn.log_softmax(logits, axis=1)
    loss = -jnp.mean(logp[jnp.arange(labels.shape[0]), labels])
    preds = jnp.argmax(logits, axis=1)
    acc = jnp.mean((preds == labels).astype(jnp.float32))
    return loss, acc


# ----------------------------------- main ---------------------------------------

if __name__ == "__main__":
    B, N, N_ori, in_dim, L, C = 2, 16, 8, 4, 32, 3

    key = jax.random.PRNGKey(0)
    ks = jax.random.split(key, 20)

    # strictly positive adjacency (avoids zero-degree division) and node features
    gs = jax.random.uniform(ks[0], (B, N, N), jnp.float32, 0.1, 1.0)
    ori_gs = jax.random.uniform(ks[1], (B, N_ori, N_ori), jnp.float32, 0.1, 1.0)
    ori_hs = jax.random.normal(ks[2], (B, N_ori, in_dim), jnp.float32)
    labels = jax.random.randint(ks[3], (B,), 0, C, jnp.int32)

    def w(k, shape):
        return 0.1 * jax.random.normal(k, shape, jnp.float32)

    params = {
        # ori_gcn1 / gcn1 / gcn2 / gcn3  (gcn4 and `out` are unused in forward)
        "oW": w(ks[4], (in_dim, L)),     "ob": w(ks[5], (1, L)),
        "W1": w(ks[6], (L, L)),          "b1": w(ks[7], (1, L)),
        "W2": w(ks[8], (L, 2 * L)),      "b2": w(ks[9], (1, 2 * L)),
        "W3": w(ks[10], (2 * L, 2 * L)), "b3": w(ks[11], (1, 2 * L)),
        # classifier
        "W1c": w(ks[12], (2 * L, 3 * L)), "b1c": w(ks[13], (1, 3 * L)),
        "W2c": w(ks[14], (3 * L, L)),     "b2c": w(ks[15], (1, L)),
        "W3c": w(ks[16], (L, C)),         "b3c": w(ks[17], (1, C)),
    }

    loss, acc = gnet_forward(gs, ori_gs, ori_hs, labels, params)
    loss, acc = jax.block_until_ready((loss, acc))

    loss_r, acc_r = ref_forward(gs, ori_gs, ori_hs, labels, params)
    assert abs(float(loss) - float(loss_r)) < 1e-3, (float(loss), float(loss_r))
    assert abs(float(acc) - float(acc_r)) < 1e-3, (float(acc), float(acc_r))

    print("KERNEL_OK")
</pallas_src>

<mosaic_0001>
module attributes {stable_mosaic.version = 11 : i64} {
  func.func @kernel(%arg0: i32, %arg1: memref<128x128xf32, #tpu.memory_space<vmem>>, %arg2: memref<384x128xf32, #tpu.memory_space<vmem>>, %arg3: memref<1x128xf32, #tpu.memory_space<vmem>>) attributes {dimension_semantics = [#tpu.dimension_semantics<arbitrary>], iteration_bounds = array<i64: 1>, scalar_prefetch = 0 : i64, scratch_operands = 0 : i64, tpu.core_type = #tpu.core_type<tc>, window_params = [{pipeline_mode = #tpu.pipeline_mode<synchronous>, transform_indices = @transform_0, window_bounds = array<i64: 128, 128>}, {pipeline_mode = #tpu.pipeline_mode<synchronous>, transform_indices = @transform_1, window_bounds = array<i64: 384, 128>}, {pipeline_mode = #tpu.pipeline_mode<synchronous>, transform_indices = @transform_2, window_bounds = array<i64: 1, 128>}]} {
    %c0 = arith.constant 0 : index
    %c0_0 = arith.constant 0 : index
    %0 = vector.load %arg1[%c0, %c0_0] : memref<128x128xf32, #tpu.memory_space<vmem>>, vector<32x32xf32>
    %c32 = arith.constant 32 : index
    %c0_1 = arith.constant 0 : index
    %1 = vector.load %arg1[%c32, %c0_1] : memref<128x128xf32, #tpu.memory_space<vmem>>, vector<32x16xf32>
    %c64 = arith.constant 64 : index
    %c0_2 = arith.constant 0 : index
    %2 = vector.load %arg1[%c64, %c0_2] : memref<128x128xf32, #tpu.memory_space<vmem>>, vector<16x16xf32>
    %c80 = arith.constant 80 : index
    %c0_3 = arith.constant 0 : index
    %3 = vector.load %arg1[%c80, %c0_3] : memref<128x128xf32, #tpu.memory_space<vmem>>, vector<2x32xf32>
    %c88 = arith.constant 88 : index
    %c0_4 = arith.constant 0 : index
    %4 = vector.load %arg1[%c88, %c0_4] : memref<128x128xf32, #tpu.memory_space<vmem>>, vector<16x16xf32>
    %c104 = arith.constant 104 : index
    %c0_5 = arith.constant 0 : index
    %5 = vector.load %arg1[%c104, %c0_5] : memref<128x128xf32, #tpu.memory_space<vmem>>, vector<16x4xf32>
    %c120 = arith.constant 120 : index
    %c0_6 = arith.constant 0 : index
    %6 = vector.load %arg1[%c120, %c0_6] : memref<128x128xf32, #tpu.memory_space<vmem>>, vector<2x1xf32>
    %cst = arith.constant dense<0.000000e+00> : vector<32xf32>
    %7 = vector.multi_reduction <add>, %0, %cst [1] : vector<32x32xf32> to vector<32xf32>
    %8 = vector.shape_cast %7 : vector<32xf32> to vector<32x1xf32>
    %9 = tpu.reciprocal %8 : vector<32x1xf32> -> vector<32x1xf32>
    %cst_7 = arith.constant dense<0.000000e+00> : vector<16xf32>
    %10 = vector.multi_reduction <add>, %2, %cst_7 [1] : vector<16x16xf32> to vector<16xf32>
    %11 = vector.shape_cast %10 : vector<16xf32> to vector<16x1xf32>
    %12 = tpu.reciprocal %11 : vector<16x1xf32> -> vector<16x1xf32>
    %cst_8 = arith.constant dense<0.000000e+00> : vector<16xf32>
    %13 = vector.multi_reduction <add>, %4, %cst_8 [1] : vector<16x16xf32> to vector<16xf32>
    %14 = vector.shape_cast %13 : vector<16xf32> to vector<16x1xf32>
    %15 = tpu.reciprocal %14 : vector<16x1xf32> -> vector<16x1xf32>
    %c0_9 = arith.constant 0 : index
    %c0_10 = arith.constant 0 : index
    %16 = vector.load %arg2[%c0_9, %c0_10] : memref<384x128xf32, #tpu.memory_space<vmem>>, vector<4x32xf32>
    %cst_11 = arith.constant dense<0.000000e+00> : vector<16x32xf32>
    %17 = tpu.matmul %5, %16, %cst_11 {dimension_numbers = #tpu.dot_dimension_numbers<[1], [0], [0], [1], [0, 0, 1, 1], [], []>} : vector<16x4xf32>, vector<4x32xf32>, vector<16x32xf32> -> vector<16x32xf32>
    %18 = vector.broadcast %12 : vector<16x1xf32> to vector<16x32xf32>
    %19 = arith.mulf %18, %17 : vector<16x32xf32>
    %cst_12 = arith.constant dense<0.000000e+00> : vector<16x32xf32>
    %20 = tpu.matmul %2, %19, %cst_12 {dimension_numbers = #tpu.dot_dimension_numbers<[1], [0], [0], [1], [0, 0, 1, 1], [], []>} : vector<16x16xf32>, vector<16x32xf32>, vector<16x32xf32> -> vector<16x32xf32>
    %c8 = arith.constant 8 : index
    %c0_13 = arith.constant 0 : index
    %21 = vector.load %arg2[%c8, %c0_13] : memref<384x128xf32, #tpu.memory_space<vmem>>, vector<1x32xf32>
    %22 = vector.broadcast %21 : vector<1x32xf32> to vector<16x32xf32>
    %23 = arith.addf %20, %22 : vector<16x32xf32>
    %cst_14 = arith.constant 0.000000e+00 : f32
    %24 = vector.broadcast %cst_14 : f32 to vector<16x32xf32>
    %25 = arith.cmpf ogt, %23, %24 : vector<16x32xf32>
    %26 = math.exp %23 : vector<16x32xf32>
    %cst_15 = arith.constant 1.000000e+00 : f32
    %27 = vector.broadcast %cst_15 : f32 to vector<16x32xf32>
    %28 = arith.subf %26, %27 : vector<16x32xf32>
    %29 = arith.select %25, %23, %28 : vector<16x32xi1>, vector<16x32xf32>
    %30 = vector.broadcast %15 : vector<16x1xf32> to vector<16x32xf32>
    %31 = arith.mulf %30, %29 : vector<16x32xf32>
    %cst_16 = arith.constant dense<0.000000e+00> : vector<32x32xf32>
    %32 = tpu.matmul %1, %31, %cst_16 {dimension_numbers = #tpu.dot_dimension_numbers<[1], [0], [0], [1], [0, 0, 1, 1], [], []>} : vector<32x16xf32>, vector<16x32xf32>, vector<32x32xf32> -> vector<32x32xf32>
    %c16 = arith.constant 16 : index
    %c0_17 = arith.constant 0 : index
    %33 = vector.load %arg2[%c16, %c0_17] : memref<384x128xf32, #tpu.memory_space<vmem>>, vector<32x32xf32>
    %cst_18 = arith.constant dense<0.000000e+00> : vector<32x32xf32>
    %34 = tpu.matmul %32, %33, %cst_18 {dimension_numbers = #tpu.dot_dimension_numbers<[1], [0], [0], [1], [0, 0, 1, 1], [], []>} : vector<32x32xf32>, vector<32x32xf32>, vector<32x32xf32> -> vector<32x32xf32>
    %c48 = arith.constant 48 : index
    %c0_19 = arith.constant 0 : index
    %35 = vector.load %arg2[%c48, %c0_19] : memref<384x128xf32, #tpu.memory_space<vmem>>, vector<1x32xf32>
    %36 = vector.broadcast %35 : vector<1x32xf32> to vector<32x32xf32>
    %37 = arith.addf %34, %36 : vector<32x32xf32>
    %cst_20 = arith.constant 0.000000e+00 : f32
    %38 = vector.broadcast %cst_20 : f32 to vector<32x32xf32>
    %39 = arith.cmpf ogt, %37, %38 : vector<32x32xf32>
    %40 = math.exp %37 : vector<32x32xf32>
    %cst_21 = arith.constant 1.000000e+00 : f32
    %41 = vector.broadcast %cst_21 : f32 to vector<32x32xf32>
    %42 = arith.subf %40, %41 : vector<32x32xf32>
    %43 = arith.select %39, %37, %42 : vector<32x32xi1>, vector<32x32xf32>
    %44 = vector.broadcast %9 : vector<32x1xf32> to vector<32x32xf32>
    %45 = arith.mulf %44, %43 : vector<32x32xf32>
    %cst_22 = arith.constant dense<0.000000e+00> : vector<32x32xf32>
    %46 = tpu.matmul %0, %45, %cst_22 {dimension_numbers = #tpu.dot_dimension_numbers<[1], [0], [0], [1], [0, 0, 1, 1], [], []>} : vector<32x32xf32>, vector<32x32xf32>, vector<32x32xf32> -> vector<32x32xf32>
    %c56 = arith.constant 56 : index
    %c0_23 = arith.constant 0 : index
    %47 = vector.load %arg2[%c56, %c0_23] : memref<384x128xf32, #tpu.memory_space<vmem>>, vector<32x64xf32>
    %cst_24 = arith.constant dense<0.000000e+00> : vector<32x64xf32>
    %48 = tpu.matmul %46, %47, %cst_24 {dimension_numbers = #tpu.dot_dimension_numbers<[1], [0], [0], [1], [0, 0, 1, 1], [], []>} : vector<32x32xf32>, vector<32x64xf32>, vector<32x64xf32> -> vector<32x64xf32>
    %c88_25 = arith.constant 88 : index
    %c0_26 = arith.constant 0 : index
    %49 = vector.load %arg2[%c88_25, %c0_26] : memref<384x128xf32, #tpu.memory_space<vmem>>, vector<1x64xf32>
    %50 = vector.broadcast %49 : vector<1x64xf32> to vector<32x64xf32>
    %51 = arith.addf %48, %50 : vector<32x64xf32>
    %cst_27 = arith.constant 0.000000e+00 : f32
    %52 = vector.broadcast %cst_27 : f32 to vector<32x64xf32>
    %53 = arith.cmpf ogt, %51, %52 : vector<32x64xf32>
    %54 = math.exp %51 : vector<32x64xf32>
    %cst_28 = arith.constant 1.000000e+00 : f32
    %55 = vector.broadcast %cst_28 : f32 to vector<32x64xf32>
    %56 = arith.subf %54, %55 : vector<32x64xf32>
    %57 = arith.select %53, %51, %56 : vector<32x64xi1>, vector<32x64xf32>
    %58 = vector.broadcast %9 : vector<32x1xf32> to vector<32x64xf32>
    %59 = arith.mulf %58, %57 : vector<32x64xf32>
    %cst_29 = arith.constant dense<0.000000e+00> : vector<2x64xf32>
    %60 = tpu.matmul %3, %59, %cst_29 {dimension_numbers = #tpu.dot_dimension_numbers<[1], [0], [0], [1], [0, 0, 1, 1], [], []>} : vector<2x32xf32>, vector<32x64xf32>, vector<2x64xf32> -> vector<2x64xf32>
    %c96 = arith.constant 96 : index
    %c0_30 = arith.constant 0 : index
    %61 = vector.load %arg2[%c96, %c0_30] : memref<384x128xf32, #tpu.memory_space<vmem>>, vector<64x64xf32>
    %cst_31 = arith.constant dense<0.000000e+00> : vector<2x64xf32>
    %62 = tpu.matmul %60, %61, %cst_31 {dimension_numbers = #tpu.dot_dimension_numbers<[1], [0], [0], [1], [0, 0, 1, 1], [], []>} : vector<2x64xf32>, vector<64x64xf32>, vector<2x64xf32> -> vector<2x64xf32>
    %c160 = arith.constant 160 : index
    %c0_32 = arith.constant 0 : index
    %63 = vector.load %arg2[%c160, %c0_32] : memref<384x128xf32, #tpu.memory_space<vmem>>, vector<1x64xf32>
    %64 = vector.broadcast %63 : vector<1x64xf32> to vector<2x64xf32>
    %65 = arith.addf %62, %64 : vector<2x64xf32>
    %cst_33 = arith.constant 0.000000e+00 : f32
    %66 = vector.broadcast %cst_33 : f32 to vector<2x64xf32>
    %67 = arith.cmpf ogt, %65, %66 : vector<2x64xf32>
    %68 = math.exp %65 : vector<2x64xf32>
    %cst_34 = arith.constant 1.000000e+00 : f32
    %69 = vector.broadcast %cst_34 : f32 to vector<2x64xf32>
    %70 = arith.subf %68, %69 : vector<2x64xf32>
    %71 = arith.select %67, %65, %70 : vector<2x64xi1>, vector<2x64xf32>
    %c168 = arith.constant 168 : index
    %c0_35 = arith.constant 0 : index
    %72 = vector.load %arg2[%c168, %c0_35] : memref<384x128xf32, #tpu.memory_space<vmem>>, vector<64x96xf32>
    %cst_36 = arith.constant dense<0.000000e+00> : vector<2x96xf32>
    %73 = tpu.matmul %71, %72, %cst_36 {dimension_numbers = #tpu.dot_dimension_numbers<[1], [0], [0], [1], [0, 0, 1, 1], [], []>} : vector<2x64xf32>, vector<64x96xf32>, vector<2x96xf32> -> vector<2x96xf32>
    %c232 = arith.constant 232 : index
    %c0_37 = arith.constant 0 : index
    %74 = vector.load %arg2[%c232, %c0_37] : memref<384x128xf32, #tpu.memory_space<vmem>>, vector<1x96xf32>
    %75 = vector.broadcast %74 : vector<1x96xf32> to vector<2x96xf32>
    %76 = arith.addf %73, %75 : vector<2x96xf32>
    %cst_38 = arith.constant 0.000000e+00 : f32
    %77 = vector.broadcast %cst_38 : f32 to vector<2x96xf32>
    %78 = arith.cmpf ogt, %76, %77 : vector<2x96xf32>
    %79 = math.exp %76 : vector<2x96xf32>
    %cst_39 = arith.constant 1.000000e+00 : f32
    %80 = vector.broadcast %cst_39 : f32 to vector<2x96xf32>
    %81 = arith.subf %79, %80 : vector<2x96xf32>
    %82 = arith.select %78, %76, %81 : vector<2x96xi1>, vector<2x96xf32>
    %c240 = arith.constant 240 : index
    %c0_40 = arith.constant 0 : index
    %83 = vector.load %arg2[%c240, %c0_40] : memref<384x128xf32, #tpu.memory_space<vmem>>, vector<96x32xf32>
    %cst_41 = arith.constant dense<0.000000e+00> : vector<2x32xf32>
    %84 = tpu.matmul %82, %83, %cst_41 {dimension_numbers = #tpu.dot_dimension_numbers<[1], [0], [0], [1], [0, 0, 1, 1], [], []>} : vector<2x96xf32>, vector<96x32xf32>, vector<2x32xf32> -> vector<2x32xf32>
    %c336 = arith.constant 336 : index
    %c0_42 = arith.constant 0 : index
    %85 = vector.load %arg2[%c336, %c0_42] : memref<384x128xf32, #tpu.memory_space<vmem>>, vector<1x32xf32>
    %86 = vector.broadcast %85 : vector<1x32xf32> to vector<2x32xf32>
    %87 = arith.addf %84, %86 : vector<2x32xf32>
    %cst_43 = arith.constant 0.000000e+00 : f32
    %88 = vector.broadcast %cst_43 : f32 to vector<2x32xf32>
    %89 = arith.cmpf ogt, %87, %88 : vector<2x32xf32>
    %90 = math.exp %87 : vector<2x32xf32>
    %cst_44 = arith.constant 1.000000e+00 : f32
    %91 = vector.broadcast %cst_44 : f32 to vector<2x32xf32>
    %92 = arith.subf %90, %91 : vector<2x32xf32>
    %93 = arith.select %89, %87, %92 : vector<2x32xi1>, vector<2x32xf32>
    %c344 = arith.constant 344 : index
    %c0_45 = arith.constant 0 : index
    %94 = vector.load %arg2[%c344, %c0_45] : memref<384x128xf32, #tpu.memory_space<vmem>>, vector<32x3xf32>
    %cst_46 = arith.constant dense<0.000000e+00> : vector<2x3xf32>
    %95 = tpu.matmul %93, %94, %cst_46 {dimension_numbers = #tpu.dot_dimension_numbers<[1], [0], [0], [1], [0, 0, 1, 1], [], []>} : vector<2x32xf32>, vector<32x3xf32>, vector<2x3xf32> -> vector<2x3xf32>
    %c376 = arith.constant 376 : index
    %c0_47 = arith.constant 0 : index
    %96 = vector.load %arg2[%c376, %c0_47] : memref<384x128xf32, #tpu.memory_space<vmem>>, vector<1x3xf32>
    %97 = vector.broadcast %96 : vector<1x3xf32> to vector<2x3xf32>
    %98 = arith.addf %95, %97 : vector<2x3xf32>
    %cst_48 = arith.constant dense<0xFF800000> : vector<2xf32>
    %99 = vector.multi_reduction <maximumf>, %98, %cst_48 [1] : vector<2x3xf32> to vector<2xf32>
    %100 = vector.shape_cast %99 : vector<2xf32> to vector<2x1xf32>
    %101 = vector.broadcast %100 : vector<2x1xf32> to vector<2x3xf32>
    %102 = arith.subf %98, %101 : vector<2x3xf32>
    %103 = math.exp %102 : vector<2x3xf32>
    %cst_49 = arith.constant dense<0.000000e+00> : vector<2xf32>
    %104 = vector.multi_reduction <add>, %103, %cst_49 [1] : vector<2x3xf32> to vector<2xf32>
    %105 = vector.shape_cast %104 : vector<2xf32> to vector<2x1xf32>
    %106 = math.log %105 : vector<2x1xf32>
    %107 = arith.addf %100, %106 : vector<2x1xf32>
    %108 = vector.broadcast %107 : vector<2x1xf32> to vector<2x3xf32>
    %109 = arith.subf %98, %108 : vector<2x3xf32>
    %110 = tpu.iota {dimensions = array<i32: 1>} : vector<2x3xi32>
    %111 = arith.fptosi %6 : vector<2x1xf32> to vector<2x1xi32>
    %112 = vector.broadcast %111 : vector<2x1xi32> to vector<2x3xi32>
    %113 = arith.cmpi eq, %110, %112 : vector<2x3xi32>
    %cst_50 = arith.constant 0.000000e+00 : f32
    %114 = vector.broadcast %cst_50 : f32 to vector<2x3xf32>
    %115 = arith.select %113, %109, %114 : vector<2x3xi1>, vector<2x3xf32>
    %116 = vector.shape_cast %115 : vector<2x3xf32> to vector<1x2x3xf32>
    %cst_51 = arith.constant dense<0.000000e+00> : vector<1xf32>
    %117 = vector.multi_reduction <add>, %116, %cst_51 [1, 2] : vector<1x2x3xf32> to vector<1xf32>
    %118 = vector.shape_cast %117 : vector<1xf32> to vector<1x1x1xf32>
    %119 = vector.extract %118[0, 0, 0] : f32 from vector<1x1x1xf32>
    %cst_52 = arith.constant 0.000000e+00 : f32
    %120 = arith.subf %cst_52, %119 : f32
    %cst_53 = arith.constant 2.000000e+00 : f32
    %121 = arith.divf %120, %cst_53 : f32
    %cst_54 = arith.constant dense<0xFF800000> : vector<2xf32>
    %122 = vector.multi_reduction <maximumf>, %109, %cst_54 [1] : vector<2x3xf32> to vector<2xf32>
    %123 = vector.shape_cast %122 : vector<2xf32> to vector<2x1xf32>
    %124 = arith.sitofp %110 : vector<2x3xi32> to vector<2x3xf32>
    %125 = vector.broadcast %123 : vector<2x1xf32> to vector<2x3xf32>
    %126 = arith.cmpf oeq, %109, %125 : vector<2x3xf32>
    %cst_55 = arith.constant 3.000000e+00 : f32
    %127 = vector.broadcast %cst_55 : f32 to vector<2x3xf32>
    %128 = arith.select %126, %124, %127 : vector<2x3xi1>, vector<2x3xf32>
    %cst_56 = arith.constant dense<0x7F800000> : vector<2xf32>
    %129 = vector.multi_reduction <minimumf>, %128, %cst_56 [1] : vector<2x3xf32> to vector<2xf32>
    %130 = vector.shape_cast %129 : vector<2xf32> to vector<2x1xf32>
    %131 = arith.cmpf oeq, %130, %6 : vector<2x1xf32>
    %132 = arith.extui %131 : vector<2x1xi1> to vector<2x1xi32>
    %133 = arith.sitofp %132 : vector<2x1xi32> to vector<2x1xf32>
    %134 = vector.shape_cast %133 : vector<2x1xf32> to vector<1x2x1xf32>
    %cst_57 = arith.constant dense<0.000000e+00> : vector<1xf32>
    %135 = vector.multi_reduction <add>, %134, %cst_57 [1, 2] : vector<1x2x1xf32> to vector<1xf32>
    %136 = vector.shape_cast %135 : vector<1xf32> to vector<1x1x1xf32>
    %137 = vector.extract %136[0, 0, 0] : f32 from vector<1x1x1xf32>
    %cst_58 = arith.constant 2.000000e+00 : f32
    %138 = arith.divf %137, %cst_58 : f32
    %139 = tpu.iota {dimensions = array<i32: 1>} : vector<1x128xi32>
    %c0_i32 = arith.constant 0 : i32
    %140 = vector.broadcast %c0_i32 : i32 to vector<1x128xi32>
    %141 = arith.cmpi eq, %139, %140 : vector<1x128xi32>
    %c1_i32 = arith.constant 1 : i32
    %142 = vector.broadcast %c1_i32 : i32 to vector<1x128xi32>
    %143 = arith.cmpi eq, %139, %142 : vector<1x128xi32>
    %cst_59 = arith.constant 0.000000e+00 : f32
    %144 = vector.broadcast %138 : f32 to vector<1x128xf32>
    %145 = vector.broadcast %cst_59 : f32 to vector<1x128xf32>
    %146 = arith.select %143, %144, %145 : vector<1x128xi1>, vector<1x128xf32>
    %147 = vector.broadcast %121 : f32 to vector<1x128xf32>
    %148 = arith.select %141, %147, %146 : vector<1x128xi1>, vector<1x128xf32>
    %c0_60 = arith.constant 0 : index
    %c0_61 = arith.constant 0 : index
    %149 = vector.load %arg3[%c0_60, %c0_61] : memref<1x128xf32, #tpu.memory_space<vmem>>, vector<1x128xf32>
    tpu.vector_store %arg3[%c0_60, %c0_61], %148 {strides = array<i32>} : memref<1x128xf32, #tpu.memory_space<vmem>>, vector<1x128xf32>,
    return
  }
  func.func @transform_0(%arg0: i32) -> (i32, i32) {
    %c0_i32 = arith.constant 0 : i32
    %c0_i32_0 = arith.constant 0 : i32
    %c0_i32_1 = arith.constant 0 : i32
    return %c0_i32, %c0_i32_0 : i32, i32
  }
  func.func @transform_1(%arg0: i32) -> (i32, i32) {
    %c0_i32 = arith.constant 0 : i32
    %c0_i32_0 = arith.constant 0 : i32
    %c0_i32_1 = arith.constant 0 : i32
    return %c0_i32, %c0_i32_0 : i32, i32
  }
  func.func @transform_2(%arg0: i32) -> (i32, i32) {
    %c0_i32 = arith.constant 0 : i32
    %c0_i32_0 = arith.constant 0 : i32
    %c0_i32_1 = arith.constant 0 : i32
    return %c0_i32, %c0_i32_0 : i32, i32
  }
}

</mosaic_0001>

<bundles_post_ra>
// kernel: tpu_custom_call.1
= control target key start
LH: loop header
LB: loop body
LE: loop exit
PB: predicated region body
PF: predicated region fallthrough
CT: control target
= control target key end

     0   :  { %7 = vsyncpa [#allocation3], 0  ;;  %s1795_s0 = inlined_call_operand.hbm [shape: f32[128,128], index: 0, kind: input, shape index: {}]   ;;  %s1796_s1 = inlined_call_operand.hbm [shape: f32[384,128], index: 1, kind: input, shape index: {}]   ;;  %s1797_s2 = inlined_call_operand.hbm [shape: f32[1,128], index: 2, kind: output, shape index: {}]  }
   0x1   :  { %8 = vsyncpa [#allocation6], 0 }
   0x2   :  { %9 = vsyncpa [#allocation4], 0  ;;  %s1653_s9 = smov [#allocation2]  }
   0x3   :  { %s15_s10 = sshll.u32 %s1653_s9, 4  ;;  %s16_s10 = int_to_ptr.vmem [resolvable:$true] %s15_s10 }
   0x4   :  { %s1595_s11 = scalar_lea.vmem %s16_s10, 2048  ;;  %p1600_p1 = scmp.lt.s32.totalorder %s16_s10, %s16_s10 }
   0x5   :  { %p1596_p0 = scmp.ne.s32.totalorder %s16_s10, %s1595_s11  ;;  %p1601_p2 = scmp.lt.s32.totalorder %s1595_s11, %s1595_s11 }
   0x7   :  { %p1602_p3 = por %p1601_p2, %p1600_p1 }
   0x9   :  { %p1603_p4 = pnand %p1602_p3, %p1596_p0 }
   0xb   :  { %1606 = shalt.err (!%p1603_p4)
}
   0xc   :  { %s1654_s12 = smov 128   ;;  %s1655_s13 = smov 8  }
   0xd   :  { %21 = dma.hbm_to_vmem [thread:$0]  %s1795_s0, 2048, %s16_s10, [#allocation3], %s1654_s12, %s1654_s12, %s1655_s13  }
   0xe   :  { %s1656_s16 = smov [#allocation5]  }
   0xf   :  { %s27_s17 = sshll.u32 %s1656_s16, 4  ;;  %s28_s17 = int_to_ptr.vmem [resolvable:$true] %s27_s17 }
  0x10   :  { %s1615_s18 = scalar_lea.vmem %s28_s17, 6144  ;;  %p1620_p6 = scmp.lt.s32.totalorder %s28_s17, %s28_s17 }
  0x11   :  { %p1616_p5 = scmp.ne.s32.totalorder %s28_s17, %s1615_s18  ;;  %p1621_p7 = scmp.lt.s32.totalorder %s1615_s18, %s1615_s18 }
  0x13   :  { %p1622_p8 = por %p1621_p7, %p1620_p6 }
  0x15   :  { %p1623_p9 = pnand %p1622_p8, %p1616_p5 }
  0x17   :  { %1626 = shalt.err (!%p1623_p9)
}
  0x18   :  { %33 = dma.hbm_to_vmem [thread:$0]  %s1796_s1, 6144, %s28_s17, [#allocation6], %s1654_s12, %s1654_s12, %s1655_s13  }
  0x19   :  { %1647 = dma.done.wait [#allocation3], 2048  }
  0x1a   :  { %1648 = vsyncadd [#allocation3], 4294965248 }
  0x1b   :  { %1649 = dma.done.wait [#allocation6], 6144  }
  0x1c   :  { %1650 = vsyncadd [#allocation6], 4294961152  ;;  %vm98_vm0 = vcmask 1043456   ;;  %vm91_vm1 = vcmask 31744   ;;  %vm73_vm2 = vcmask 130048   ;;  %v53_v1 = vld [vmem:[#allocation2 + $0x68] sm:$0xff] }
  0x1d   :  { %v90_v0 = vld [vmem:[#allocation5] sm:$0xf]  ;;  %v54_v2 = vld [vmem:[#allocation2 + $0x70] sm:$0xff]  ;;  %1377 = vmatprep.mubr.msk.f32.mxu0 %vm91_vm1, %v53_v1  ;;  %v49_v3 = vld [vmem:[#allocation2 + $0x48] sm:$0xff]  ;;  %vm56_vm5 = vcmask 261120   ;;  %vm1658_vm10 = vmmov 0  }
  0x1e   :  { %1375 = vmatprep.subr.msk.mxu0 %vm98_vm0, %v90_v0  ;;  %v48_v4 = vld [vmem:[#allocation2 + $0x40] sm:$0xff]  ;;  %v77_v5 = vsel %vm73_vm2, %v49_v3, 0.0  ;;  %v51_v8 = vld [vmem:[#allocation2 + $0x58] sm:$0xff]  ;;  %v1253_v20 = vld [vmem:[#allocation5 + $0x8] ss:$0 sm:$0xff]  ;;  %vm817_vm15 = vcmask 523264  }
  0x1f   :  { %1376 = vmatpush3.msk.msra.mxu0 %vm98_vm0, %v90_v0  ;;  %1384 = vmatprep.mubr.msk.f32.mxu1 %vm73_vm2, %v48_v4  ;;  %v74_v6 = vsel %vm73_vm2, %v48_v4, 0.0  ;;  %v52_v7 = vld [vmem:[#allocation2 + $0x60] sm:$0xff]  ;;  %v82_v10 = vsel %vm73_vm2, %v51_v8, 0.0  ;;  %v45_v39 = vld [vmem:[#allocation2 + $0x28] sm:$0xff]  ;;  %v46_v41 = vld [vmem:[#allocation2 + $0x30] sm:$0xff]  ;;  %s1660_s24 = smov [#allocation7]  }
  0x20   :  { %1378 = vmatmul.mubr.msk.f32.vlgmr.msra.gmra.mxu0 %vm91_vm1, %v54_v2  ;;  %78 = vadd.xlane.f32.xlu0 %v77_v5  ;;  %v85_v9 = vsel %vm73_vm2, %v52_v7, 0.0  ;;  %v44_v19 = vld [vmem:[#allocation2 + $0x20] sm:$0xff]  ;;  %v377_v40 = vld [vmem:[#allocation5 + $0x28] sm:$0xff]  ;;  %v47_v43 = vld [vmem:[#allocation2 + $0x38] sm:$0xff]  ;;  %vm1004_vm1 = vcmask 785408   ;;  %s1240_s25 = sshll.u32 %s1660_s24, 4  ;;  %s1241_s25 = int_to_ptr.vmem [resolvable:$true] %s1240_s25 }
  0x21   :  { %86 = vadd.xlane.f32.xlu1 %v85_v9  ;;  %1391 = vmatprep.mubr.msk.f32.mxu0 %vm73_vm2, %v44_v19  ;;  %v376_v42 = vld [vmem:[#allocation5 + $0x20] sm:$0xff]  ;;  %v375_v44 = vld [vmem:[#allocation5 + $0x18] sm:$0xff]  ;;  %v374_v45 = vld [vmem:[#allocation5 + $0x10] sm:$0xff]  ;;  %s1627_s26 = scalar_lea.vmem %s1241_s25, 16  ;;  %s1631_s27 = scalar_lea.vmem %s1241_s25, 32 }
  0x22   :  { %v1692_v46 = vld [vmem:[#allocation2 + $0x18] sm:$0xff]  ;;  %v1694_v47 = vld [vmem:[#allocation2 + $0x10] sm:$0xff]  ;;  %v1696_v48 = vld [vmem:[#allocation2 + $0x8] sm:$0xff]  ;;  %p1628_p10 = scmp.ne.s32.totalorder %s1241_s25, %s1627_s26  ;;  %p1632_p11 = scmp.lt.s32.totalorder %s1241_s25, %s1241_s25 }
  0x23   :  { %v66_v49 = vsel %vm56_vm5, %v1692_v46, 0.0  ;;  %v63_v50 = vsel %vm56_vm5, %v1694_v47, 0.0  ;;  %v40_v51 = vld [vmem:[#allocation2] sm:$0xff]  ;;  %v60_v52 = vsel %vm56_vm5, %v1696_v48, 0.0  ;;  %v604_v58 = vld [vmem:[#allocation5 + $0x50] sm:$0xff]  ;;  %v603_v59 = vld [vmem:[#allocation5 + $0x48] sm:$0xff]  ;;  %p1633_p12 = scmp.lt.s32.totalorder %s1631_s27, %s1627_s26 }
  0x24   :  { %75 = vadd.xlane.f32.xlu0 %v74_v6  ;;  %v57_v53 = vsel %vm56_vm5, %v40_v51, 0.0  ;;  %v1262_v60 = vld [vmem:[#allocation5 + $0x30] ss:$0 sm:$0xff] }
  0x25   :  { %83 = vadd.xlane.f32.xlu1 %v82_v10  ;;  %p1634_p13 = por %p1633_p12, %p1632_p11 }
  0x27   :  { %p1635_p0 = pnand %p1634_p13, %p1628_p10 }
  0x28   :  { %67 = vadd.xlane.f32.xlu0 %v66_v49 }
  0x29   :  { %64 = vadd.xlane.f32.xlu1 %v63_v50 }
  0x2c   :  { %61 = vadd.xlane.f32.xlu0 %v60_v52 }
  0x2d   :  { %58 = vadd.xlane.f32.xlu1 %v57_v53 }
  0xa9   :  { %v79_v11 = vpop.xlane.xlu0 %78 }
  0xaa   :  { %1541 = vrcp.f32 %v79_v11  ;;  %v87_v21 = vpop.xlane.xlu1 %86 }
  0xad   :  { %v76_v12 = vpop.xlane.xlu0 %75 }
  0xae   :  { %1543 = vrcp.f32 %v76_v12  ;;  %v84_v28 = vpop.xlane.xlu1 %83 }
  0xb1   :  { %v68_v4 = vpop.xlane.xlu0 %67 }
  0xb2   :  { %v65_v8 = vpop.xlane.xlu1 %64 }
  0xb5   :  { %v62_v11 = vpop.xlane.xlu0 %61 }
  0xb6   :  { %v59_v12 = vpop.xlane.xlu1 %58 }
  0xb7   :  { %v1542_v13 = vpop.eup %1541 }
  0xbb   :  { %v1544_v14 = vpop.eup %1543 }
  0xe0   :  { %v1379_v15 = vpop.f32.mrf.mxu0 }
  0xe1   :  { %v178_v16 = vmul.f32 %v1542_v13, %v1379_v15 }
  0xe2   :  { %v168_v17 = vpop.f32.mrf.mxu0 }
  0xe3   :  { %v177_v18 = vmul.f32 %v1544_v14, %v168_v17  ;;  %1380 = vmatprep.subr.mxu1 %v178_v16 }
  0xe4   :  { %1381 = vmatpush3.msra.mxu1 %v178_v16 }
  0xe5   :  { %1382 = vmatprep.subr.mxu1 %v177_v18 }
  0xe6   :  { %1383 = vmatpush3.msra.mxu1 %v177_v18 }
  0xe7   :  { %1385 = vmatmul.mubr.msk.f32.vlgmr.msra.gmra.mxu1 %vm73_vm2, %v49_v3  ;;  %1425 = vmatprep.subr.mxu1 %v604_v58 }
  0xe8   :  { %1426 = vmatpush3.msra.mxu1 %v604_v58 }
  0xe9   :  { %1427 = vmatprep.subr.mxu1 %v603_v59 }
  0xea   :  { %1428 = vmatpush3.msra.mxu1 %v603_v59 }
 0x1a7   :  { %v1386_v22 = vpop.f32.mrf.mxu1 }
 0x1a8   :  { %v262_v23 = vadd.f32 %v1386_v22, %v1253_v20 }
 0x1a9   :  { %v256_v24 = vpop.f32.mrf.mxu1 }
 0x1aa   :  { %v269_v25 = vmul.f32 1.442695, %v262_v23  ;;  %v257_v26 = vadd.f32 %v1253_v20, %v256_v24  ;;  %vm266_vm3 = vcmp.gt.f32.partialorder %v262_v23, 0.0 }
 0x1ac   :  { %1545 = vpow2.f32 %v269_v25  ;;  %v267_v27 = vmul.f32 1.442695, %v257_v26  ;;  %vm265_vm4 = vcmp.gt.f32.partialorder %v257_v26, 0.0 }
 0x1ad   :  { %1547 = vrcp.f32 %v87_v21 }
 0x1ae   :  { %1549 = vpow2.f32 %v267_v27 }
 0x1af   :  { %1551 = vrcp.f32 %v84_v28 }
 0x1b9   :  { %v1546_v29 = vpop.eup %1545 }
 0x1ba   :  { %v1548_v30 = vpop.eup %1547  ;;  %v1257_v31 = vadd.f32 -1.0, %v1546_v29 }
 0x1bb   :  { %v1550_v32 = vpop.eup %1549 }
 0x1bc   :  { %v1552_v33 = vpop.eup %1551  ;;  %v1256_v34 = vadd.f32 -1.0, %v1550_v32  ;;  %v274_v35 = vsel %vm266_vm3, %v262_v23, %v1257_v31 }
 0x1bd   :  { %v276_v36 = vmul.f32 %v1548_v30, %v274_v35 }
 0x1be   :  { %v273_v37 = vsel %vm265_vm4, %v257_v26, %v1256_v34  ;;  %v601_v34 = vld [vmem:[#allocation5 + $0x38] sm:$0xff]  ;;  %vm1165_vm4 = vcmask 17408  }
 0x1bf   :  { %1387 = vmatprep.subr.mxu0 %v276_v36  ;;  %v275_v38 = vmul.f32 %v1552_v33, %v273_v37  ;;  %v602_v33 = vld [vmem:[#allocation5 + $0x40] sm:$0xff] }
 0x1c0   :  { %1388 = vmatpush3.msra.mxu0 %v276_v36  ;;  %1429 = vmatprep.subr.mxu1 %v602_v33 }
 0x1c1   :  { %1389 = vmatprep.subr.mxu0 %v275_v38  ;;  %1430 = vmatpush3.msra.mxu1 %v602_v33  ;;  %v997_v33 = vld [vmem:[#allocation5 + $0x140] sm:$0xff] }
 0x1c2   :  { %1390 = vmatpush3.msra.mxu0 %v275_v38  ;;  %1431 = vmatprep.subr.mxu1 %v601_v34 }
 0x1c3   :  { %1392 = vmatmul.mubr.msk.f32.vlgmr.msra.gmra.mxu0 %vm73_vm2, %v45_v39  ;;  %1397 = vmatprep.subr.mxu0 %v377_v40  ;;  %v1657_v39 = vmov 0.0  }
 0x1c4   :  { %1394 = vmatprep.mubr.msk.f32.mxu0 %vm73_vm2, %v46_v41  ;;  %1398 = vmatpush3.msra.mxu0 %v377_v40  ;;  %v811_v40 = vld [vmem:[#allocation5 + $0x98] sm:$0xff]  ;;  %v810_v41 = vld [vmem:[#allocation5 + $0x90] sm:$0xff] }
 0x1c5   :  { %1399 = vmatprep.subr.mxu0 %v376_v42  ;;  %1432 = vmatpush3.msra.mxu1 %v601_v34  ;;  %v996_v34 = vld [vmem:[#allocation5 + $0x138] sm:$0xff] }
 0x1c6   :  { %1400 = vmatpush3.msra.mxu0 %v376_v42  ;;  %1450 = vmatprep.subr.mxu1 %v1657_v39  ;;  %v809_v42 = vld [vmem:[#allocation5 + $0x88] sm:$0xff] }
 0x1c7   :  { %1395 = vmatmul.mubr.msk.f32.gmra.mxu0 %vm73_vm2, %v47_v43  ;;  %1401 = vmatprep.subr.mxu0 %v375_v44  ;;  %v808_v43 = vld [vmem:[#allocation5 + $0x80] sm:$0xff] }
 0x1c8   :  { %1402 = vmatpush3.msra.mxu0 %v375_v44  ;;  %v807_v44 = vld [vmem:[#allocation5 + $0x78] sm:$0xff] }
 0x1c9   :  { %1403 = vmatprep.subr.mxu0 %v374_v45 }
 0x1ca   :  { %1404 = vmatpush3.msra.mxu0 %v374_v45  ;;  %v806_v45 = vld [vmem:[#allocation5 + $0x70] sm:$0xff] }
 0x283   :  { %v1393_v54 = vpop.f32.mrf.mxu0 }
 0x285   :  { %v355_v55 = vpop.f32.mrf.mxu0 }
 0x286   :  { %1405 = vmatprep.mubr.msk.f32.mxu0 %vm56_vm5, %v355_v55 }
 0x287   :  { %v1396_v56 = vpop.f32.mrf.mxu0  ;;  %1406 = vmatmul.mubr.msk.f32.vlgmr.msra.gmra.mxu0 %vm56_vm5, %v1393_v54 }
 0x289   :  { %v365_v57 = vpop.f32.mrf.mxu0 }
 0x28a   :  { %1408 = vmatprep.mubr.msk.f32.mxu0 %vm56_vm5, %v365_v57 }
 0x28b   :  { %1409 = vmatmul.mubr.msk.f32.gmra.mxu0 %vm56_vm5, %v1396_v56 }
 0x28c   :  { %1419 = vmatprep.mubr.msk.f32.mxu0 %vm56_vm5, %v40_v51 }
 0x347   :  { %v1407_v61 = vpop.f32.mrf.mxu0 }
 0x348   :  { %v467_v62 = vadd.f32 %v1407_v61, %v1262_v60 }
 0x349   :  { %v461_v63 = vpop.f32.mrf.mxu0 }
 0x34a   :  { %v486_v0 = vmul.f32 1.442695, %v467_v62  ;;  %v462_v1 = vadd.f32 %v1262_v60, %v461_v63  ;;  %vm481_vm7 = vcmp.gt.f32.partialorder %v467_v62, 0.0 }
 0x34b   :  { %v1410_v2 = vpop.f32.mrf.mxu0 }
 0x34c   :  { %v484_v3 = vmul.f32 1.442695, %v462_v1  ;;  %v477_v5 = vadd.f32 %v1410_v2, %v1262_v60  ;;  %1553 = vpow2.f32 %v486_v0  ;;  %vm480_vm9 = vcmp.gt.f32.partialorder %v462_v1, 0.0 }
 0x34d   :  { %v471_v6 = vpop.f32.mrf.mxu0 }
 0x34e   :  { %v490_v7 = vmul.f32 1.442695, %v477_v5  ;;  %v472_v9 = vadd.f32 %v1262_v60, %v471_v6  ;;  %1555 = vpow2.f32 %v484_v3  ;;  %vm483_vm6 = vcmp.gt.f32.partialorder %v477_v5, 0.0 }
 0x350   :  { %1557 = vpow2.f32 %v490_v7  ;;  %v488_v10 = vmul.f32 1.442695, %v472_v9  ;;  %vm482_vm8 = vcmp.gt.f32.partialorder %v472_v9, 0.0 }
 0x351   :  { %1559 = vrcp.f32 %v68_v4 }
 0x352   :  { %1561 = vpow2.f32 %v488_v10 }
 0x353   :  { %1563 = vrcp.f32 %v65_v8 }
 0x354   :  { %1565 = vrcp.f32 %v62_v11 }
 0x355   :  { %1567 = vrcp.f32 %v59_v12  ;;  %v50_v12 = vld [vmem:[#allocation2 + $0x50] sm:$0x3] }
 0x359   :  { %v1554_v13 = vpop.eup %1553 }
 0x35a   :  { %v1268_v17 = vadd.f32 -1.0, %v1554_v13  ;;  %v804_v13 = vld [vmem:[#allocation5 + $0x60] sm:$0xff] }
 0x35b   :  { %v1556_v14 = vpop.eup %1555 }
 0x35c   :  { %v1267_v21 = vadd.f32 -1.0, %v1556_v14  ;;  %v497_v27 = vsel %vm481_vm7, %v467_v62, %v1268_v17  ;;  %v902_v17 = vld [vmem:[#allocation5 + $0xd8] sm:$0xff]  ;;  %vm1213_vm7 = vcmask 1024  }
 0x35d   :  { %v1558_v15 = vpop.eup %1557 }
 0x35e   :  { %v1710_v16 = vpop.eup %1559  ;;  %v1270_v18 = vadd.f32 -1.0, %v1558_v15  ;;  %v496_v30 = vsel %vm480_vm9, %v462_v1, %v1267_v21  ;;  %v898_v21 = vld [vmem:[#allocation5 + $0xb8] sm:$0xff] }
 0x35f   :  { %v1562_v19 = vpop.eup %1561 }
 0x360   :  { %v1712_v20 = vpop.eup %1563  ;;  %v1269_v22 = vadd.f32 -1.0, %v1562_v19  ;;  %v499_v23 = vsel %vm483_vm6, %v477_v5, %v1270_v18  ;;  %v901_v18 = vld [vmem:[#allocation5 + $0xd0] sm:$0xff]  ;;  %v900_v19 = vld [vmem:[#allocation5 + $0xc8] sm:$0xff] }
 0x361   :  { %v503_v24 = vmul.f32 %v1710_v16, %v499_v23  ;;  %v1715_v25 = vpop.eup %1565  ;;  %v896_v23 = vld [vmem:[#allocation5 + $0xa8] sm:$0xff] }
 0x362   :  { %v498_v26 = vsel %vm482_vm8, %v472_v9, %v1269_v22  ;;  %v1718_v29 = vpop.eup %1567  ;;  %v501_v31 = vmul.f32 %v1715_v25, %v497_v27  ;;  %v897_v22 = vld [vmem:[#allocation5 + $0xb0] sm:$0xff] }
 0x363   :  { %1411 = vmatprep.subr.mxu0 %v503_v24  ;;  %v502_v28 = vmul.f32 %v1712_v20, %v498_v26  ;;  %v500_v32 = vmul.f32 %v1718_v29, %v496_v30 }
 0x364   :  { %1412 = vmatpush3.msra.mxu0 %v503_v24  ;;  %v998_v24 = vld [vmem:[#allocation5 + $0x148] sm:$0xff] }
 0x365   :  { %1413 = vmatprep.subr.mxu0 %v502_v28 }
 0x366   :  { %1414 = vmatpush3.msra.mxu0 %v502_v28 }
 0x367   :  { %1415 = vmatprep.subr.mxu0 %v501_v31 }
 0x368   :  { %1416 = vmatpush3.msra.mxu0 %v501_v31 }
 0x369   :  { %1417 = vmatprep.subr.mxu0 %v500_v32 }
 0x36a   :  { %1418 = vmatpush3.msra.mxu0 %v500_v32 }
 0x36b   :  { %1420 = vmatmul.mubr.msk.f32.vlgmr.msra.gmra.mxu0 %vm56_vm5, %v1696_v48  ;;  %1439 = vmatprep.subr.mxu0 %v1657_v39 }
 0x36c   :  { %1422 = vmatprep.mubr.msk.f32.mxu0 %vm56_vm5, %v1694_v47  ;;  %v1275_v47 = vld [vmem:[#allocation5 + $0x58] ss:$0 sm:$0xff] }
 0x36f   :  { %1423 = vmatmul.mubr.msk.f32.gmra.mxu0 %vm56_vm5, %v1692_v46  ;;  %v805_v46 = vld [vmem:[#allocation5 + $0x68] sm:$0xff] }
 0x370   :  { %1447 = vmatprep.mubr.msk.f32.mxu0 %vm1658_vm10, %v1657_v39 }
 0x42b   :  { %v1421_v35 = vpop.f32.mrf.mxu0 }
 0x42d   :  { %v582_v36 = vpop.f32.mrf.mxu0 }
 0x42e   :  { %1433 = vmatprep.mubr.msk.f32.mxu1 %vm56_vm5, %v582_v36  ;;  %v994_v36 = vld [vmem:[#allocation5 + $0x128] sm:$0xff] }
 0x42f   :  { %v1424_v37 = vpop.f32.mrf.mxu0  ;;  %1434 = vmatmul.mubr.msk.f32.vlgmr.msra.gmra.mxu1 %vm56_vm5, %v1421_v35  ;;  %v995_v35 = vld [vmem:[#allocation5 + $0x130] sm:$0xff] }
 0x430   :  { %1451 = vmatpush3.msra.mxu1 %v811_v40  ;;  %v991_v40 = vld [vmem:[#allocation5 + $0x110] sm:$0xff] }
 0x431   :  { %v592_v38 = vpop.f32.mrf.mxu0  ;;  %1452 = vmatprep.subr.mxu1 %v1657_v39 }
 0x432   :  { %1436 = vmatprep.mubr.msk.f32.mxu1 %vm56_vm5, %v592_v38  ;;  %1453 = vmatpush3.msra.mxu1 %v810_v41  ;;  %v992_v38 = vld [vmem:[#allocation5 + $0x118] sm:$0xff]  ;;  %v990_v41 = vld [vmem:[#allocation5 + $0x108] sm:$0xff] }
 0x433   :  { %1437 = vmatmul.mubr.msk.f32.gmra.mxu1 %vm56_vm5, %v1424_v37  ;;  %1454 = vmatprep.subr.mxu1 %v1657_v39  ;;  %v993_v37 = vld [vmem:[#allocation5 + $0x120] sm:$0xff] }
 0x434   :  { %1466 = vmatprep.mubr.msk.f32.mxu1 %vm1658_vm10, %v1657_v39  ;;  %1455 = vmatpush3.msra.mxu1 %v809_v42  ;;  %v989_v42 = vld [vmem:[#allocation5 + $0x100] sm:$0xff] }
 0x435   :  { %1456 = vmatprep.subr.mxu1 %v1657_v39 }
 0x436   :  { %1457 = vmatpush3.msra.mxu1 %v808_v43  ;;  %v988_v43 = vld [vmem:[#allocation5 + $0xf8] sm:$0xff] }
 0x437   :  { %1458 = vmatprep.subr.mxu1 %v1657_v39 }
 0x438   :  { %1459 = vmatpush3.msra.mxu1 %v807_v44  ;;  %v987_v44 = vld [vmem:[#allocation5 + $0xf0] sm:$0xff] }
 0x439   :  { %1460 = vmatprep.subr.mxu1 %v1657_v39 }
 0x43a   :  { %1461 = vmatpush3.msra.mxu1 %v806_v45  ;;  %v1288_v45 = vld [vmem:[#allocation5 + $0xe8] ss:$0 sm:$0xff] }
 0x43b   :  { %1462 = vmatprep.subr.mxu1 %v1657_v39 }
 0x43c   :  { %1463 = vmatpush3.msra.mxu1 %v805_v46 }
 0x43d   :  { %1464 = vmatprep.subr.mxu1 %v1657_v39 }
 0x43e   :  { %1465 = vmatpush3.msra.mxu1 %v804_v13 }
 0x43f   :  { %1488 = vmatprep.subr.mxu1 %v1657_v39 }
 0x4ef   :  { %v1435_v48 = vpop.f32.mrf.mxu1 }
 0x4f0   :  { %v694_v49 = vadd.f32 %v1435_v48, %v1275_v47 }
 0x4f1   :  { %v688_v50 = vpop.f32.mrf.mxu1 }
 0x4f2   :  { %v713_v51 = vmul.f32 1.442695, %v694_v49  ;;  %v689_v52 = vadd.f32 %v1275_v47, %v688_v50  ;;  %vm708_vm12 = vcmp.gt.f32.partialorder %v694_v49, 0.0 }
 0x4f3   :  { %v1438_v53 = vpop.f32.mrf.mxu1 }
 0x4f4   :  { %v711_v54 = vmul.f32 1.442695, %v689_v52  ;;  %v704_v55 = vadd.f32 %v1438_v53, %v1275_v47  ;;  %1569 = vpow2.f32 %v713_v51  ;;  %vm707_vm14 = vcmp.gt.f32.partialorder %v689_v52, 0.0  ;;  %v1086_v53 = vld [vmem:[#allocation5 + $0x170] sm:$0xff] }
 0x4f5   :  { %v698_v56 = vpop.f32.mrf.mxu1 }
 0x4f6   :  { %v717_v57 = vmul.f32 1.442695, %v704_v55  ;;  %v699_v58 = vadd.f32 %v1275_v47, %v698_v56  ;;  %1571 = vpow2.f32 %v711_v54  ;;  %vm710_vm11 = vcmp.gt.f32.partialorder %v704_v55, 0.0  ;;  %v1085_v54 = vld [vmem:[#allocation5 + $0x168] sm:$0xff]  ;;  %v1083_v56 = vld [vmem:[#allocation5 + $0x158] sm:$0xff] }
 0x4f8   :  { %1573 = vpow2.f32 %v717_v57  ;;  %v715_v59 = vmul.f32 1.442695, %v699_v58  ;;  %vm709_vm13 = vcmp.gt.f32.partialorder %v699_v58, 0.0  ;;  %v1291_v57 = vld [vmem:[#allocation5 + $0x150] ss:$0 sm:$0xff] }
 0x4fa   :  { %1575 = vpow2.f32 %v715_v59 }
 0x501   :  { %v1570_v60 = vpop.eup %1569 }
 0x502   :  { %v1281_v63 = vadd.f32 -1.0, %v1570_v60 }
 0x503   :  { %v1572_v61 = vpop.eup %1571 }
 0x504   :  { %v1280_v2 = vadd.f32 -1.0, %v1572_v61  ;;  %v724_v6 = vsel %vm708_vm12, %v694_v49, %v1281_v63 }
 0x505   :  { %v1574_v62 = vpop.eup %1573  ;;  %v728_v10 = vmul.f32 %v1715_v25, %v724_v6  ;;  %v1285_v25 = vld [vmem:[#allocation5 + $0xa0] ss:$0 sm:$0xff] }
 0x506   :  { %v1283_v0 = vadd.f32 -1.0, %v1574_v62  ;;  %v723_v9 = vsel %vm707_vm14, %v689_v52, %v1280_v2 }
 0x507   :  { %v1576_v1 = vpop.eup %1575  ;;  %v727_v11 = vmul.f32 %v1718_v29, %v723_v9 }
 0x508   :  { %v726_v3 = vsel %vm710_vm11, %v704_v55, %v1283_v0  ;;  %v1282_v4 = vadd.f32 -1.0, %v1576_v1  ;;  %v1084_v55 = vld [vmem:[#allocation5 + $0x160] sm:$0xff]  ;;  %v1294_v1 = vld [vmem:[#allocation5 + $0x178] ss:$0 sm:$0xff] }
 0x509   :  { %v730_v5 = vmul.f32 %v1710_v16, %v726_v3  ;;  %v903_v16 = vld [vmem:[#allocation5 + $0xe0] sm:$0xff] }
 0x50a   :  { %v725_v7 = vsel %vm709_vm13, %v699_v58, %v1282_v4 }
 0x50b   :  { %v729_v8 = vmul.f32 %v1712_v20, %v725_v7  ;;  %1440 = vmatpush3.msra.mxu0 %v730_v5  ;;  %v899_v20 = vld [vmem:[#allocation5 + $0xc0] sm:$0xff] }
 0x50c   :  { %1441 = vmatprep.subr.mxu0 %v1657_v39 }
 0x50d   :  { %1442 = vmatpush3.msra.mxu0 %v729_v8 }
 0x50e   :  { %1443 = vmatprep.subr.mxu0 %v1657_v39 }
 0x50f   :  { %1444 = vmatpush3.msra.mxu0 %v728_v10 }
 0x510   :  { %1445 = vmatprep.subr.mxu0 %v1657_v39 }
 0x511   :  { %1446 = vmatpush3.msra.mxu0 %v727_v11  ;;  %v1659_v11 = vmov 0  }
 0x512   :  { %1448 = vmatmul.mubr.msk.f32.vlgmr.msra.gmra.mxu0 %vm56_vm5, %v50_v12  ;;  %1469 = vmatprep.subr.mxu0 %v1657_v39 }
 0x513   :  { %1485 = vmatprep.mubr.msk.f32.mxu0 %vm1658_vm10, %v1657_v39  ;;  %1470 = vmatpush3.msra.mxu0 %v903_v16 }
 0x514   :  { %1471 = vmatprep.subr.mxu0 %v1657_v39  ;;  %1540 = vset.pattern.permute.xlu0 %v1659_v11 }
 0x515   :  { %1472 = vmatpush3.msra.mxu0 %v902_v17 }
 0x516   :  { %1473 = vmatprep.subr.mxu0 %v1657_v39 }
 0x517   :  { %1474 = vmatpush3.msra.mxu0 %v901_v18  ;;  %v55_v18 = vld [vmem:[#allocation2 + $0x78] sm:$0x3] }
 0x518   :  { %1475 = vmatprep.subr.mxu0 %v1657_v39 }
 0x519   :  { %1476 = vmatpush3.msra.mxu0 %v900_v19  ;;  %v1526_v19 = vtrunc.f32 %v55_v18 }
 0x51a   :  { %1477 = vmatprep.subr.mxu0 %v1657_v39 }
 0x51b   :  { %1478 = vmatpush3.msra.mxu0 %v899_v20  ;;  %v1527_v20 = vcvt.f32.s32 %v1526_v19 }
 0x51c   :  { %1479 = vmatprep.subr.mxu0 %v1657_v39 }
 0x51d   :  { %1480 = vmatpush3.msra.mxu0 %v898_v21  ;;  %v1179_v21 = vlaneseq }
 0x51e   :  { %1481 = vmatprep.subr.mxu0 %v1657_v39 }
 0x51f   :  { %1482 = vmatpush3.msra.mxu0 %v897_v22  ;;  %v1180_v22 = vand.u32 127, %v1179_v21 }
 0x520   :  { %1483 = vmatprep.subr.mxu0 %v1657_v39 }
 0x521   :  { %1484 = vmatpush3.msra.mxu0 %v896_v23  ;;  %v1204_v23 = vcvt.s32.f32 %v1180_v22  ;;  %vm1228_vm9 = vcmp.eq.s32.totalorder %v1180_v22, 1 }
 0x522   :  { %1515 = vmatprep.subr.mxu0 %v1657_v39 }
 0x5d2   :  { %v800_v14 = vpop.f32.mrf.mxu0 }
 0x5d3   :  { %1467 = vmatmul.mubr.msk.f32.vlgmr.msra.gmra.mxu1 %vm817_vm15, %v800_v14 }
 0x5d4   :  { %v1449_v15 = vpop.f32.mrf.mxu0  ;;  %1512 = vmatprep.mubr.msk.f32.mxu1 %vm1658_vm10, %v1657_v39  ;;  %1489 = vmatpush3.msra.mxu1 %v998_v24 }
 0x5d5   :  { %1490 = vmatprep.subr.mxu1 %v1657_v39 }
 0x5d6   :  { %1491 = vmatpush3.msra.mxu1 %v997_v33 }
 0x5d7   :  { %1492 = vmatprep.subr.mxu1 %v1657_v39 }
 0x5d8   :  { %1493 = vmatpush3.msra.mxu1 %v996_v34 }
 0x5d9   :  { %1494 = vmatprep.subr.mxu1 %v1657_v39 }
 0x5da   :  { %1495 = vmatpush3.msra.mxu1 %v995_v35 }
 0x5db   :  { %1496 = vmatprep.subr.mxu1 %v1657_v39 }
 0x5dc   :  { %1497 = vmatpush3.msra.mxu1 %v994_v36 }
 0x5dd   :  { %1498 = vmatprep.subr.mxu1 %v1657_v39 }
 0x5de   :  { %1499 = vmatpush3.msra.mxu1 %v993_v37 }
 0x5df   :  { %1500 = vmatprep.subr.mxu1 %v1657_v39 }
 0x5e0   :  { %1501 = vmatpush3.msra.mxu1 %v992_v38 }
 0x5e1   :  { %1502 = vmatprep.subr.mxu1 %v1657_v39 }
 0x5e2   :  { %1503 = vmatpush3.msra.mxu1 %v991_v40 }
 0x5e3   :  { %1504 = vmatprep.subr.mxu1 %v1657_v39 }
 0x5e4   :  { %1505 = vmatpush3.msra.mxu1 %v990_v41 }
 0x5e5   :  { %1506 = vmatprep.subr.mxu1 %v1657_v39 }
 0x5e6   :  { %1507 = vmatpush3.msra.mxu1 %v989_v42 }
 0x5e7   :  { %1508 = vmatprep.subr.mxu1 %v1657_v39 }
 0x5e8   :  { %1509 = vmatpush3.msra.mxu1 %v988_v43 }
 0x5e9   :  { %1510 = vmatprep.subr.mxu1 %v1657_v39 }
 0x5ea   :  { %1511 = vmatpush3.msra.mxu1 %v987_v44 }
 0x693   :  { %v887_v26 = vpop.f32.mrf.mxu1 }
 0x694   :  { %v888_v27 = vadd.f32 %v1285_v25, %v887_v26 }
 0x695   :  { %v1468_v28 = vpop.f32.mrf.mxu1 }
 0x696   :  { %v892_v29 = vmul.f32 1.442695, %v888_v27  ;;  %vm891_vm0 = vcmp.gt.f32.partialorder %v888_v27, 0.0 }
 0x698   :  { %1577 = vpow2.f32 %v892_v29 }
 0x6a5   :  { %v1578_v30 = vpop.eup %1577 }
 0x6a6   :  { %v1287_v31 = vadd.f32 -1.0, %v1578_v30 }
 0x6a8   :  { %v895_v32 = vsel %vm891_vm0, %v888_v27, %v1287_v31 }
 0x6a9   :  { %1486 = vmatmul.mubr.msk.f32.vlgmr.msra.gmra.mxu0 %vm817_vm15, %v895_v32 }
 0x6aa   :  { %1523 = vmatprep.mubr.msk.f32.mxu0 %vm1658_vm10, %v1657_v39  ;;  %1516 = vmatpush3.msra.mxu0 %v1086_v53  ;;  %vm1227_vm10 = vcmp.eq.s32.totalorder %v1180_v22, 0 }
 0x6ab   :  { %1517 = vmatprep.subr.mxu0 %v1657_v39 }
 0x6ac   :  { %1518 = vmatpush3.msra.mxu0 %v1085_v54 }
 0x6ad   :  { %1519 = vmatprep.subr.mxu0 %v1657_v39 }
 0x6ae   :  { %1520 = vmatpush3.msra.mxu0 %v1084_v55 }
 0x6af   :  { %1521 = vmatprep.subr.mxu0 %v1657_v39 }
 0x6b0   :  { %1522 = vmatpush3.msra.mxu0 %v1083_v56 }
 0x769   :  { %v978_v46 = vpop.f32.mrf.mxu0 }
 0x76a   :  { %v979_v47 = vadd.f32 %v1288_v45, %v978_v46 }
 0x76b   :  { %v1487_v48 = vpop.f32.mrf.mxu0 }
 0x76c   :  { %v983_v49 = vmul.f32 1.442695, %v979_v47  ;;  %vm982_vm2 = vcmp.gt.f32.partialorder %v979_v47, 0.0 }
 0x76e   :  { %1579 = vpow2.f32 %v983_v49 }
 0x77b   :  { %v1580_v50 = vpop.eup %1579 }
 0x77c   :  { %v1290_v51 = vadd.f32 -1.0, %v1580_v50 }
 0x77e   :  { %v986_v52 = vsel %vm982_vm2, %v979_v47, %v1290_v51 }
 0x77f   :  { %1513 = vmatmul.mubr.msk.f32.vlgmr.msra.gmra.mxu1 %vm1004_vm1, %v986_v52 }
 0x83f   :  { %v1074_v58 = vpop.f32.mrf.mxu1 }
 0x840   :  { %v1075_v59 = vadd.f32 %v1291_v57, %v1074_v58 }
 0x841   :  { %v1514_v60 = vpop.f32.mrf.mxu1 }
 0x842   :  { %v1079_v61 = vmul.f32 1.442695, %v1075_v59  ;;  %vm1078_vm3 = vcmp.gt.f32.partialorder %v1075_v59, 0.0 }
 0x844   :  { %1581 = vpow2.f32 %v1079_v61 }
 0x851   :  { %v1582_v62 = vpop.eup %1581 }
 0x852   :  { %v1293_v63 = vadd.f32 -1.0, %v1582_v62 }
 0x854   :  { %v1082_v0 = vsel %vm1078_vm3, %v1075_v59, %v1293_v63 }
 0x855   :  { %1524 = vmatmul.mubr.msk.f32.vlgmr.msra.gmra.mxu0 %vm56_vm5, %v1082_v0 }
 0x915   :  { %v1161_v2 = vpop.f32.mrf.mxu0 }
 0x916   :  { %v1162_v3 = vadd.f32 %v1294_v1, %v1161_v2 }
 0x917   :  { %v1525_v4 = vpop.f32.mrf.mxu0 }
 0x918   :  { %v1166_v5 = vsel %vm1165_vm4, %v1162_v3, -inf }
 0x919   :  { %1167 = vmax.xlane.f32.xlu0 %v1166_v5 }
 0x9a2   :  { %v1168_v6 = vpop.xlane.xlu0 %1167 }
 0x9a3   :  { %v1169_v7 = vsub.f32 %v1162_v3, %v1168_v6 }
 0x9a5   :  { %v1170_v8 = vmul.f32 1.442695, %v1169_v7 }
 0x9a7   :  { %1583 = vpow2.f32 %v1170_v8 }
 0x9b4   :  { %v1584_v9 = vpop.eup %1583 }
 0x9b5   :  { %v1172_v10 = vsel %vm1165_vm4, %v1584_v9, 0.0 }
 0x9b6   :  { %1173 = vadd.xlane.f32.xlu1 %v1172_v10 }
 0xa3f   :  { %v1174_v12 = vpop.xlane.xlu1 %1173 }
 0xa40   :  { %1585 = vlog2.f32 %v1174_v12 }
 0xa4d   :  { %v1586_v13 = vpop.eup %1585 }
 0xa4e   :  { %v1176_v14 = vmul.f32 0.6931472, %v1586_v13 }
 0xa50   :  { %v1177_v15 = vadd.f32 %v1176_v14, %v1168_v6 }
 0xa52   :  { %v1178_v16 = vsub.f32 %v1162_v3, %v1177_v15 }
 0xa54   :  { %v1201_v17 = vsel %vm1165_vm4, %v1178_v16, -inf }
 0xa55   :  { %1202 = vmax.xlane.f32.xlu0 %v1201_v17 }
 0xa6b   :  { %1183 = vperm.xlu0 %1540, %v1527_v20  }
 0xade   :  { %v1203_v24 = vpop.xlane.xlu0 %1202 }
 0xadf   :  { %vm1205_vm5 = vcmp.eq.f32.partialorder %v1178_v16, %v1203_v24 }
 0xae0   :  { %v1206_v25 = vsel %vm1205_vm5, %v1204_v23, 3.0 }
 0xae1   :  { %v1207_v26 = vsel %vm1165_vm4, %v1206_v25, inf }
 0xae2   :  { %1208 = vmin.xlane.f32.xlu1 %v1207_v26 }
 0xae6   :  { %v1184_v27 = vpop.permute.xlu0 %1183 }
 0xae7   :  { %vm1185_vm6 = vcmp.eq.s32.totalorder %v1180_v22, %v1184_v27 }
 0xae8   :  { %v1186_v28 = vsel %vm1185_vm6, %v1178_v16, 0.0 }
 0xae9   :  { %v1187_v29 = vsel %vm1165_vm4, %v1186_v28, 0.0 }
 0xaea   :  { %1188 = vadd.xlane.f32.xlu1 %v1187_v29 }
 0xb6b   :  { %v1209_v30 = vpop.xlane.xlu1 %1208 }
 0xb6c   :  { %vm1210_vm8 = vcmp.eq.f32.partialorder %v1209_v30, %v55_v18 }
 0xb6d   :  { %v1296_v31 = vsel %vm1210_vm8, 1.0, %v1657_v39 }
 0xb6e   :  { %v1214_v32 = vsel %vm1213_vm7, %v1296_v31, 0.0 }
 0xb6f   :  { %1215 = vadd.xlane.f32.xlu1 %v1214_v32 }
 0xb73   :  { %v1189_v33 = vpop.xlane.xlu1 %1188 }
 0xb74   :  { %v1190_v34 = vrot.slane %v1189_v33, 4 }
 0xb76   :  { %v1191_v35 = vadd.f32 %v1190_v34, %v1189_v33 }
 0xb78   :  { %v1192_v36 = vrot.slane %v1191_v35, 2 }
 0xb7a   :  { %v1193_v37 = vadd.f32 %v1192_v36, %v1191_v35 }
 0xb7c   :  { %v1194_v38 = vrot.slane %v1193_v37, 1 }
 0xb7e   :  { %v1195_v40 = vadd.f32 %v1194_v38, %v1193_v37 }
 0xb80   :  { %1528 = vpush %v1195_v40 }
 0xbb1   :  { %s1529_s0 = spop %1528 }
 0xbb2   :  { %s1197_s1 = ssub.f32 0.0, %s1529_s0 }
 0xbb4   :  { %s1200_s21 = smul.f32 0.5, %s1197_s1 }
 0xbb6   :  { %v1231_v48 = vstv %s1200_s21 }
 0xbf8   :  { %v1216_v41 = vpop.xlane.xlu1 %1215 }
 0xbf9   :  { %v1217_v42 = vrot.slane %v1216_v41, 4 }
 0xbfb   :  { %v1218_v43 = vadd.f32 %v1217_v42, %v1216_v41 }
 0xbfd   :  { %v1219_v44 = vrot.slane %v1218_v43, 2 }
 0xbff   :  { %v1220_v45 = vadd.f32 %v1219_v44, %v1218_v43 }
 0xc01   :  { %v1221_v46 = vrot.slane %v1220_v45, 1 }
 0xc03   :  { %v1222_v47 = vadd.f32 %v1221_v46, %v1220_v45 }
 0xc05   :  { %1530 = vpush %v1222_v47 }
 0xc36   :  { %s1531_s22 = spop %1530 }
 0xc37   :  { %s1226_s23 = smul.f32 0.5, %s1531_s22 }
 0xc39   :  { %v1229_v39 = vstv %s1226_s23 }
 0xc3a   :  { %v1230_v49 = vsel %vm1228_vm9, %v1229_v39, 0.0 }
 0xc3b   :  { %v1232_v50 = vsel %vm1227_vm10, %v1231_v48, %v1230_v49 }
 0xc3c   :  { %1233 = vst [vmem:[#allocation7] sm:$0x1] %v1232_v50 }
 0xc3d   :  { %1638 = shalt.err (!%p1635_p0)
}
 0xc3e   :  { %1243 = dma.vmem_to_hbm [thread:$0]  %s1241_s25, 16, %s1797_s2, [#allocation4]  }
 0xc3f   :  { %1651 = dma.done.wait [#allocation4], 16  }
 0xc40   :  { %1652 = vsyncadd [#allocation4], 4294967280 }
 0xc41   :  { %1247 = vsyncpa [#allocation3], 1 }
 0xc42   :  { %1248 = vsyncpa [#allocation6], 1 }
 0xc43   :  { %1249 = vsyncpa [#allocation4], 1 }

</bundles_post_ra>
